<compile_context>
chip_gen: v7x
topology: tpu7x:2x2x1
jax: 0.10.0
libtpu: 0.0.40
codegen_flags: <defaults>
</compile_context>

<pallas_src>
import jax
import jax.numpy as jnp
from jax.experimental import pallas as pl
from jax.experimental.pallas import tpu as pltpu

# ----- config (mirrors cfg.MODEL.*) -----
NUM_TIMES = 4            # cfg.MODEL.PROJECT.NUM_TIMES
CHANNEL = 64             # cfg.MODEL.BACKBONE.CHANNEL (== CLIP embed dim)
HIDDEN = CHANNEL // 8
ADAPTER_RATIO = 0.6      # cfg.MODEL.ADAPTER.RATIO
LIF_THRESH = 0.5
LIF_TAU = 0.25
BN_EPS = 1e-5
IMG_SIZE = 224
NUM_CLASSES = 10


# --------------------------------------------------------------------------
# Fully fused kernel: thresholding -> visual matmul -> Adapter -> logits.
# Rows are TIME-MAJOR (row = t*B + b) so every per-view slice is contiguous.
# --------------------------------------------------------------------------
def _pointclip_kernel(ch0_ref, ch1_ref, wv_ref, bv_ref,
                      s1_ref, sh1_ref, w1_ref, b1_ref,
                      s2_ref, sh2_ref, w2_ref, b2_ref,
                      textn_ref, scale_ref, out_ref, spike_ref):
    bsz = out_ref.shape[0]

    # mv_proj thresholding: ch1>0 -> 0 overrides ch0>0 -> 255, else 127
    img = jnp.where(ch0_ref[...] > 0.0, 255.0, 127.0)
    img = jnp.where(ch1_ref[...] > 0.0, 0.0, img)             # (T*B, H*W)

    # Visual encoder.  The 224x224 bilinear upsample, the unsqueeze/repeat to 3
    # channels and the (/255 - 0.5) normalization are all pre-folded into wv/bv.
    # TODO(synk): synthetic projection stands in for the pretrained CLIP visual encoder.
    feat = jnp.dot(img, wv_ref[...],
                   preferred_element_type=jnp.float32) + bv_ref[...]   # (T*B, C)

    # Adapter global_f prefix — view-independent, so one batched matmul over all rows:
    xn = feat * s1_ref[...] + sh1_ref[...]                    # BatchNorm1d(C), eval (folded)
    h = jnp.dot(xn, w1_ref[...],
                preferred_element_type=jnp.float32) + b1_ref[...]      # Dropout = id
    hn = h * s2_ref[...] + sh2_ref[...]                       # BatchNorm1d(C/8), eval (folded)

    # LIFSpike membrane recurrence across the T views (the only sequential part).
    mem = jnp.zeros((bsz, HIDDEN), jnp.float32)               # m.mem = 0 reset
    for t in range(NUM_TIMES):                                # static unroll, T == 4
        mem = mem * LIF_TAU + hn[t * bsz:(t + 1) * bsz, :]
        spike = (mem - LIF_THRESH >= 0.0).astype(jnp.float32)
        mem = (1.0 - spike) * mem
        spike_ref[t * bsz:(t + 1) * bsz, :] = spike           # stage in VMEM scratch

    # view_f: Linear(C/8 -> C) + ReLU (one batched matmul) and the residual fusion.
    v = jnp.dot(spike_ref[...], w2_ref[...],
                preferred_element_type=jnp.float32) + b2_ref[...]
    fused = jnp.maximum(v, 0.0) * ADAPTER_RATIO + feat * (1.0 - ADAPTER_RATIO)

    # L2-normalize the concatenated (B, T*C) feature (computed piecewise, no concat
    # materialized) and emit the scaled cosine logits vs the pre-normalized text.
    ncls = textn_ref.shape[1]
    sq = jnp.zeros((bsz, 1), jnp.float32)
    acc = jnp.zeros((bsz, ncls), jnp.float32)
    for t in range(NUM_TIMES):
        f_t = fused[t * bsz:(t + 1) * bsz, :]                 # (B, C) view t
        sq = sq + jnp.sum(f_t * f_t, axis=-1, keepdims=True)
        acc = acc + jax.lax.dot_general(
            f_t, textn_ref[t], (((1,), (1,)), ((), ())),
            preferred_element_type=jnp.float32)

    # eps guards degenerate all-zero feature rows (the PyTorch reference would NaN)
    inv_norm = jax.lax.rsqrt(sq + 1e-12)
    out_ref[...] = scale_ref[0, 0] * inv_norm * acc


def pointclip_fused(ch0, ch1, w_vis_small, b_vis_eff, adapter_folded, text_nt,
                    logit_scale_exp):
    tb = ch0.shape[0]
    b = tb // NUM_TIMES
    ncls = text_nt.shape[1]
    n_vmem = 4 + len(adapter_folded) + 1                      # ch0, ch1, wv, bv, adapter, text
    return pl.pallas_call(
        _pointclip_kernel,
        out_shape=jax.ShapeDtypeStruct((b, ncls), jnp.float32),
        in_specs=[pl.BlockSpec(memory_space=pltpu.MemorySpace.VMEM)] * n_vmem
                 + [pl.BlockSpec(memory_space=pltpu.MemorySpace.SMEM)],
        out_specs=pl.BlockSpec(memory_space=pltpu.MemorySpace.VMEM),
        scratch_shapes=[pltpu.VMEM((tb, HIDDEN), jnp.float32)],
    )(ch0, ch1, w_vis_small, b_vis_eff, *adapter_folded, text_nt, logit_scale_exp)


# --------------------------------------------------------------------------
# One-time parameter folding (runs once, outside the jitted forward).
# --------------------------------------------------------------------------
def prepare_pointclip_params(w_vis_full, b_vis, adapter_params, text_feat,
                             logit_scale, h=16, w=16):
    hw_big = IMG_SIZE * IMG_SIZE

    # 3-channel grayscale repeat folded into the weight:  y = img @ (W0 + W1 + W2) + b
    w_folded = (w_vis_full[0 * hw_big:1 * hw_big]
                + w_vis_full[1 * hw_big:2 * hw_big]
                + w_vis_full[2 * hw_big:3 * hw_big])           # (224*224, C)

    # Bilinear upsample (h,w) -> (224,224) is a linear map; fold it into the weight
    # by pushing the exact jax.image.resize operator matrix M (h*w, 224*224) through W.
    # (F.upsample bilinear uses align_corners=False == half-pixel centers, same as
    # jax.image.resize 'bilinear'.)
    basis = jnp.eye(h * w, dtype=jnp.float32).reshape(h * w, h, w)
    up = jax.vmap(lambda im: jax.image.resize(im, (IMG_SIZE, IMG_SIZE),
                                              method="bilinear"))
    M = up(basis).reshape(h * w, hw_big)                       # (h*w, 224*224)

    # (x/255 - 0.5) affine folded:  W' = (M @ W)/255,  b' = b - 0.5 * sum(W, axis=0)
    w_vis_small = (M @ w_folded) * (1.0 / 255.0)               # (h*w, C) ~ 64 KB f32
    b_vis_eff = b_vis - 0.5 * jnp.sum(w_folded, axis=0, keepdims=True)

    # BatchNorm1d eval-mode -> single FMA per feature inside the kernel
    g1, be1, rm1, rv1, w1, b1, g2, be2, rm2, rv2, w2, b2 = adapter_params
    s1 = g1 * jax.lax.rsqrt(rv1 + BN_EPS)
    sh1 = be1 - rm1 * s1
    s2 = g2 * jax.lax.rsqrt(rv2 + BN_EPS)
    sh2 = be2 - rm2 * s2
    adapter_folded = (s1, sh1, w1, b1, s2, sh2, w2, b2)

    # text features are constant per call: normalize once, split per view -> (T, NC, C)
    ncls = text_feat.shape[0]
    text_n = text_feat / jnp.linalg.norm(text_feat, axis=-1, keepdims=True)
    text_nt = text_n.reshape(ncls, NUM_TIMES, CHANNEL).transpose(1, 0, 2)

    logit_scale_exp = jnp.exp(logit_scale).reshape(1, 1)       # logit_scale.exp()
    return w_vis_small, b_vis_eff, adapter_folded, text_nt, logit_scale_exp


# --------------------------------------------------------------------------
# Full forward
# --------------------------------------------------------------------------
@jax.jit
def pointclip_forward(pc, w_vis_small, b_vis_eff, adapter_folded, text_nt,
                      logit_scale_exp):
    b, t, c, h, w = pc.shape
    # Threshold channels laid out TIME-MAJOR (row = t*B + b) so the kernel's
    # per-view slices are contiguous.  Tiny (~16 KB) reshapes; everything else fused.
    ch0 = jnp.transpose(pc[:, :, 0, :, :], (1, 0, 2, 3)).reshape(t * b, h * w)
    ch1 = jnp.transpose(pc[:, :, 1, :, :], (1, 0, 2, 3)).reshape(t * b, h * w)
    return pointclip_fused(ch0.astype(jnp.float32), ch1.astype(jnp.float32),
                           w_vis_small, b_vis_eff, adapter_folded,
                           text_nt, logit_scale_exp)


if __name__ == "__main__":
    key = jax.random.PRNGKey(0)
    k_pc, k_vis, k_visb, k_txt, *k_ad = jax.random.split(key, 16)

    B, T, C_pc, H, W = 2, NUM_TIMES, 3, 16, 16
    pc = jax.random.normal(k_pc, (B, T, C_pc, H, W), jnp.float32)

    # synthetic visual-encoder projection  TODO(synk): replaces pretrained CLIP visual
    K_in = 3 * IMG_SIZE * IMG_SIZE
    w_vis = jax.random.normal(k_vis, (K_in, CHANNEL), jnp.float32) * 0.01
    b_vis = jax.random.normal(k_visb, (1, CHANNEL), jnp.float32) * 0.01

    def nrm(k, shape, scale):
        return jax.random.normal(k, shape, jnp.float32) * scale

    # Adapter parameters (deterministic): BN1, Linear1, BN2, Linear2
    g1 = 1.0 + nrm(k_ad[0], (1, CHANNEL), 0.1)
    be1 = nrm(k_ad[1], (1, CHANNEL), 0.1)
    rm1 = nrm(k_ad[2], (1, CHANNEL), 0.1)
    rv1 = 1.0 + jnp.abs(nrm(k_ad[3], (1, CHANNEL), 0.1))
    w1 = nrm(k_ad[4], (CHANNEL, HIDDEN), 0.2)
    b1 = nrm(k_ad[5], (1, HIDDEN), 0.1)
    g2 = 1.0 + nrm(k_ad[6], (1, HIDDEN), 0.1)
    be2 = nrm(k_ad[7], (1, HIDDEN), 0.1)
    rm2 = nrm(k_ad[8], (1, HIDDEN), 0.1)
    rv2 = 1.0 + jnp.abs(nrm(k_ad[9], (1, HIDDEN), 0.1))
    w2 = nrm(k_ad[10], (HIDDEN, CHANNEL), 0.2)
    b2 = nrm(k_ad[11], (1, CHANNEL), 0.1)
    adapter_params = (g1, be1, rm1, rv1, w1, b1, g2, be2, rm2, rv2, w2, b2)

    # synthetic text features  TODO(synk): replaces CLIP tokenizer + text encoder
    text_base = jax.random.normal(k_txt, (NUM_CLASSES, CHANNEL), jnp.float32)
    text_feat = jnp.tile(text_base, (1, NUM_TIMES))            # .repeat(1, NUM_TIMES)

    logit_scale = jnp.full((1, 1), jnp.log(1.0 / 0.07), jnp.float32)  # CLIP init

    prepared = prepare_pointclip_params(w_vis, b_vis, adapter_params,
                                        text_feat, logit_scale, h=H, w=W)
    logits = pointclip_forward(pc, *prepared)
    logits = jax.block_until_ready(logits)
    assert logits.shape == (B, NUM_CLASSES)
    assert bool(jnp.all(jnp.isfinite(logits)))
    print("KERNEL_OK")
</pallas_src>

<mosaic_0001>
module attributes {stable_mosaic.version = 11 : i64} {
  func.func @_pointclip_kernel(%arg0: memref<8x256xf32, #tpu.memory_space<vmem>>, %arg1: memref<8x256xf32, #tpu.memory_space<vmem>>, %arg2: memref<256x64xf32, #tpu.memory_space<vmem>>, %arg3: memref<1x64xf32, #tpu.memory_space<vmem>>, %arg4: memref<1x64xf32, #tpu.memory_space<vmem>>, %arg5: memref<1x64xf32, #tpu.memory_space<vmem>>, %arg6: memref<64x8xf32, #tpu.memory_space<vmem>>, %arg7: memref<1x8xf32, #tpu.memory_space<vmem>>, %arg8: memref<1x8xf32, #tpu.memory_space<vmem>>, %arg9: memref<1x8xf32, #tpu.memory_space<vmem>>, %arg10: memref<8x64xf32, #tpu.memory_space<vmem>>, %arg11: memref<1x64xf32, #tpu.memory_space<vmem>>, %arg12: memref<4x10x64xf32, #tpu.memory_space<vmem>>, %arg13: memref<1x1xf32, #tpu.memory_space<smem>>, %arg14: memref<2x10xf32, #tpu.memory_space<vmem>>, %arg15: memref<8x8xf32, #tpu.memory_space<vmem>>) attributes {dimension_semantics = [], scalar_prefetch = 0 : i64, scratch_operands = 1 : i64, tpu.core_type = #tpu.core_type<tc>} {
    %c0 = arith.constant 0 : index
    %c0_0 = arith.constant 0 : index
    %0 = vector.load %arg0[%c0, %c0_0] : memref<8x256xf32, #tpu.memory_space<vmem>>, vector<8x256xf32>
    %cst = arith.constant 0.000000e+00 : f32
    %1 = vector.broadcast %cst : f32 to vector<8x256xf32>
    %2 = arith.cmpf ogt, %0, %1 : vector<8x256xf32>
    %cst_1 = arith.constant 2.550000e+02 : f32
    %cst_2 = arith.constant 1.270000e+02 : f32
    %3 = vector.broadcast %cst_1 : f32 to vector<8x256xf32>
    %4 = vector.broadcast %cst_2 : f32 to vector<8x256xf32>
    %5 = arith.select %2, %3, %4 : vector<8x256xi1>, vector<8x256xf32>
    %c0_3 = arith.constant 0 : index
    %c0_4 = arith.constant 0 : index
    %6 = vector.load %arg1[%c0_3, %c0_4] : memref<8x256xf32, #tpu.memory_space<vmem>>, vector<8x256xf32>
    %cst_5 = arith.constant 0.000000e+00 : f32
    %7 = vector.broadcast %cst_5 : f32 to vector<8x256xf32>
    %8 = arith.cmpf ogt, %6, %7 : vector<8x256xf32>
    %cst_6 = arith.constant 0.000000e+00 : f32
    %9 = vector.broadcast %cst_6 : f32 to vector<8x256xf32>
    %10 = arith.select %8, %9, %5 : vector<8x256xi1>, vector<8x256xf32>
    %c0_7 = arith.constant 0 : index
    %c0_8 = arith.constant 0 : index
    %11 = vector.load %arg2[%c0_7, %c0_8] : memref<256x64xf32, #tpu.memory_space<vmem>>, vector<256x64xf32>
    %cst_9 = arith.constant dense<0.000000e+00> : vector<8x64xf32>
    %12 = tpu.matmul %10, %11, %cst_9 {dimension_numbers = #tpu.dot_dimension_numbers<[1], [0], [0], [1], [0, 0, 1, 1], [], []>} : vector<8x256xf32>, vector<256x64xf32>, vector<8x64xf32> -> vector<8x64xf32>
    %c0_10 = arith.constant 0 : index
    %c0_11 = arith.constant 0 : index
    %13 = vector.load %arg3[%c0_10, %c0_11] : memref<1x64xf32, #tpu.memory_space<vmem>>, vector<1x64xf32>
    %14 = vector.broadcast %13 : vector<1x64xf32> to vector<8x64xf32>
    %15 = arith.addf %12, %14 : vector<8x64xf32>
    %c0_12 = arith.constant 0 : index
    %c0_13 = arith.constant 0 : index
    %16 = vector.load %arg4[%c0_12, %c0_13] : memref<1x64xf32, #tpu.memory_space<vmem>>, vector<1x64xf32>
    %17 = vector.broadcast %16 : vector<1x64xf32> to vector<8x64xf32>
    %18 = arith.mulf %15, %17 : vector<8x64xf32>
    %c0_14 = arith.constant 0 : index
    %c0_15 = arith.constant 0 : index
    %19 = vector.load %arg5[%c0_14, %c0_15] : memref<1x64xf32, #tpu.memory_space<vmem>>, vector<1x64xf32>
    %20 = vector.broadcast %19 : vector<1x64xf32> to vector<8x64xf32>
    %21 = arith.addf %18, %20 : vector<8x64xf32>
    %c0_16 = arith.constant 0 : index
    %c0_17 = arith.constant 0 : index
    %22 = vector.load %arg6[%c0_16, %c0_17] : memref<64x8xf32, #tpu.memory_space<vmem>>, vector<64x8xf32>
    %cst_18 = arith.constant dense<0.000000e+00> : vector<8x8xf32>
    %23 = tpu.matmul %21, %22, %cst_18 {dimension_numbers = #tpu.dot_dimension_numbers<[1], [0], [0], [1], [0, 0, 1, 1], [], []>} : vector<8x64xf32>, vector<64x8xf32>, vector<8x8xf32> -> vector<8x8xf32>
    %c0_19 = arith.constant 0 : index
    %c0_20 = arith.constant 0 : index
    %24 = vector.load %arg7[%c0_19, %c0_20] : memref<1x8xf32, #tpu.memory_space<vmem>>, vector<1x8xf32>
    %25 = vector.broadcast %24 : vector<1x8xf32> to vector<8x8xf32>
    %26 = arith.addf %23, %25 : vector<8x8xf32>
    %c0_21 = arith.constant 0 : index
    %c0_22 = arith.constant 0 : index
    %27 = vector.load %arg8[%c0_21, %c0_22] : memref<1x8xf32, #tpu.memory_space<vmem>>, vector<1x8xf32>
    %28 = vector.broadcast %27 : vector<1x8xf32> to vector<8x8xf32>
    %29 = arith.mulf %26, %28 : vector<8x8xf32>
    %c0_23 = arith.constant 0 : index
    %c0_24 = arith.constant 0 : index
    %30 = vector.load %arg9[%c0_23, %c0_24] : memref<1x8xf32, #tpu.memory_space<vmem>>, vector<1x8xf32>
    %31 = vector.broadcast %30 : vector<1x8xf32> to vector<8x8xf32>
    %32 = arith.addf %29, %31 : vector<8x8xf32>
    %cst_25 = arith.constant 0.000000e+00 : f32
    %33 = vector.broadcast %cst_25 : f32 to vector<2x8xf32>
    %cst_26 = arith.constant 2.500000e-01 : f32
    %34 = vector.broadcast %cst_26 : f32 to vector<2x8xf32>
    %35 = arith.mulf %33, %34 : vector<2x8xf32>
    %36 = vector.extract_strided_slice %32 {offsets = [0, 0], sizes = [2, 8], strides = [1, 1]} : vector<8x8xf32> to vector<2x8xf32>
    %37 = arith.addf %35, %36 : vector<2x8xf32>
    %cst_27 = arith.constant 5.000000e-01 : f32
    %38 = vector.broadcast %cst_27 : f32 to vector<2x8xf32>
    %39 = arith.subf %37, %38 : vector<2x8xf32>
    %cst_28 = arith.constant 0.000000e+00 : f32
    %40 = vector.broadcast %cst_28 : f32 to vector<2x8xf32>
    %41 = arith.cmpf oge, %39, %40 : vector<2x8xf32>
    %42 = arith.extui %41 : vector<2x8xi1> to vector<2x8xi32>
    %43 = arith.sitofp %42 : vector<2x8xi32> to vector<2x8xf32>
    %cst_29 = arith.constant 1.000000e+00 : f32
    %44 = vector.broadcast %cst_29 : f32 to vector<2x8xf32>
    %45 = arith.subf %44, %43 : vector<2x8xf32>
    %46 = arith.mulf %45, %37 : vector<2x8xf32>
    %c0_30 = arith.constant 0 : index
    %c0_31 = arith.constant 0 : index
    %47 = vector.load %arg15[%c0_30, %c0_31] : memref<8x8xf32, #tpu.memory_space<vmem>>, vector<2x8xf32>
    tpu.vector_store %arg15[%c0_30, %c0_31], %43 {strides = array<i32>} : memref<8x8xf32, #tpu.memory_space<vmem>>, vector<2x8xf32>,
    %cst_32 = arith.constant 2.500000e-01 : f32
    %48 = vector.broadcast %cst_32 : f32 to vector<2x8xf32>
    %49 = arith.mulf %46, %48 : vector<2x8xf32>
    %50 = vector.extract_strided_slice %32 {offsets = [2, 0], sizes = [2, 8], strides = [1, 1]} : vector<8x8xf32> to vector<2x8xf32>
    %51 = arith.addf %49, %50 : vector<2x8xf32>
    %cst_33 = arith.constant 5.000000e-01 : f32
    %52 = vector.broadcast %cst_33 : f32 to vector<2x8xf32>
    %53 = arith.subf %51, %52 : vector<2x8xf32>
    %cst_34 = arith.constant 0.000000e+00 : f32
    %54 = vector.broadcast %cst_34 : f32 to vector<2x8xf32>
    %55 = arith.cmpf oge, %53, %54 : vector<2x8xf32>
    %56 = arith.extui %55 : vector<2x8xi1> to vector<2x8xi32>
    %57 = arith.sitofp %56 : vector<2x8xi32> to vector<2x8xf32>
    %cst_35 = arith.constant 1.000000e+00 : f32
    %58 = vector.broadcast %cst_35 : f32 to vector<2x8xf32>
    %59 = arith.subf %58, %57 : vector<2x8xf32>
    %60 = arith.mulf %59, %51 : vector<2x8xf32>
    %c2 = arith.constant 2 : index
    %c0_36 = arith.constant 0 : index
    %61 = vector.load %arg15[%c2, %c0_36] : memref<8x8xf32, #tpu.memory_space<vmem>>, vector<2x8xf32>
    tpu.vector_store %arg15[%c2, %c0_36], %57 {strides = array<i32>} : memref<8x8xf32, #tpu.memory_space<vmem>>, vector<2x8xf32>,
    %cst_37 = arith.constant 2.500000e-01 : f32
    %62 = vector.broadcast %cst_37 : f32 to vector<2x8xf32>
    %63 = arith.mulf %60, %62 : vector<2x8xf32>
    %64 = vector.extract_strided_slice %32 {offsets = [4, 0], sizes = [2, 8], strides = [1, 1]} : vector<8x8xf32> to vector<2x8xf32>
    %65 = arith.addf %63, %64 : vector<2x8xf32>
    %cst_38 = arith.constant 5.000000e-01 : f32
    %66 = vector.broadcast %cst_38 : f32 to vector<2x8xf32>
    %67 = arith.subf %65, %66 : vector<2x8xf32>
    %cst_39 = arith.constant 0.000000e+00 : f32
    %68 = vector.broadcast %cst_39 : f32 to vector<2x8xf32>
    %69 = arith.cmpf oge, %67, %68 : vector<2x8xf32>
    %70 = arith.extui %69 : vector<2x8xi1> to vector<2x8xi32>
    %71 = arith.sitofp %70 : vector<2x8xi32> to vector<2x8xf32>
    %cst_40 = arith.constant 1.000000e+00 : f32
    %72 = vector.broadcast %cst_40 : f32 to vector<2x8xf32>
    %73 = arith.subf %72, %71 : vector<2x8xf32>
    %74 = arith.mulf %73, %65 : vector<2x8xf32>
    %c4 = arith.constant 4 : index
    %c0_41 = arith.constant 0 : index
    %75 = vector.load %arg15[%c4, %c0_41] : memref<8x8xf32, #tpu.memory_space<vmem>>, vector<2x8xf32>
    tpu.vector_store %arg15[%c4, %c0_41], %71 {strides = array<i32>} : memref<8x8xf32, #tpu.memory_space<vmem>>, vector<2x8xf32>,
    %cst_42 = arith.constant 2.500000e-01 : f32
    %76 = vector.broadcast %cst_42 : f32 to vector<2x8xf32>
    %77 = arith.mulf %74, %76 : vector<2x8xf32>
    %78 = vector.extract_strided_slice %32 {offsets = [6, 0], sizes = [2, 8], strides = [1, 1]} : vector<8x8xf32> to vector<2x8xf32>
    %79 = arith.addf %77, %78 : vector<2x8xf32>
    %cst_43 = arith.constant 5.000000e-01 : f32
    %80 = vector.broadcast %cst_43 : f32 to vector<2x8xf32>
    %81 = arith.subf %79, %80 : vector<2x8xf32>
    %cst_44 = arith.constant 0.000000e+00 : f32
    %82 = vector.broadcast %cst_44 : f32 to vector<2x8xf32>
    %83 = arith.cmpf oge, %81, %82 : vector<2x8xf32>
    %84 = arith.extui %83 : vector<2x8xi1> to vector<2x8xi32>
    %85 = arith.sitofp %84 : vector<2x8xi32> to vector<2x8xf32>
    %c6 = arith.constant 6 : index
    %c0_45 = arith.constant 0 : index
    %86 = vector.load %arg15[%c6, %c0_45] : memref<8x8xf32, #tpu.memory_space<vmem>>, vector<2x8xf32>
    tpu.vector_store %arg15[%c6, %c0_45], %85 {strides = array<i32>} : memref<8x8xf32, #tpu.memory_space<vmem>>, vector<2x8xf32>,
    %c0_46 = arith.constant 0 : index
    %c0_47 = arith.constant 0 : index
    %87 = vector.load %arg15[%c0_46, %c0_47] : memref<8x8xf32, #tpu.memory_space<vmem>>, vector<8x8xf32>
    %c0_48 = arith.constant 0 : index
    %c0_49 = arith.constant 0 : index
    %88 = vector.load %arg10[%c0_48, %c0_49] : memref<8x64xf32, #tpu.memory_space<vmem>>, vector<8x64xf32>
    %cst_50 = arith.constant dense<0.000000e+00> : vector<8x64xf32>
    %89 = tpu.matmul %87, %88, %cst_50 {dimension_numbers = #tpu.dot_dimension_numbers<[1], [0], [0], [1], [0, 0, 1, 1], [], []>} : vector<8x8xf32>, vector<8x64xf32>, vector<8x64xf32> -> vector<8x64xf32>
    %c0_51 = arith.constant 0 : index
    %c0_52 = arith.constant 0 : index
    %90 = vector.load %arg11[%c0_51, %c0_52] : memref<1x64xf32, #tpu.memory_space<vmem>>, vector<1x64xf32>
    %91 = vector.broadcast %90 : vector<1x64xf32> to vector<8x64xf32>
    %92 = arith.addf %89, %91 : vector<8x64xf32>
    %cst_53 = arith.constant 0.000000e+00 : f32
    %93 = vector.broadcast %cst_53 : f32 to vector<8x64xf32>
    %94 = arith.maximumf %92, %93 : vector<8x64xf32>
    %cst_54 = arith.constant 6.000000e-01 : f32
    %95 = vector.broadcast %cst_54 : f32 to vector<8x64xf32>
    %96 = arith.mulf %94, %95 : vector<8x64xf32>
    %cst_55 = arith.constant 4.000000e-01 : f32
    %97 = vector.broadcast %cst_55 : f32 to vector<8x64xf32>
    %98 = arith.mulf %15, %97 : vector<8x64xf32>
    %99 = arith.addf %96, %98 : vector<8x64xf32>
    %cst_56 = arith.constant 0.000000e+00 : f32
    %100 = vector.broadcast %cst_56 : f32 to vector<2x1xf32>
    %cst_57 = arith.constant 0.000000e+00 : f32
    %101 = vector.broadcast %cst_57 : f32 to vector<2x10xf32>
    %102 = vector.extract_strided_slice %99 {offsets = [0, 0], sizes = [2, 64], strides = [1, 1]} : vector<8x64xf32> to vector<2x64xf32>
    %103 = arith.mulf %102, %102 : vector<2x64xf32>
    %cst_58 = arith.constant dense<0.000000e+00> : vector<2xf32>
    %104 = vector.multi_reduction <add>, %103, %cst_58 [1] : vector<2x64xf32> to vector<2xf32>
    %105 = vector.shape_cast %104 : vector<2xf32> to vector<2x1xf32>
    %106 = arith.addf %100, %105 : vector<2x1xf32>
    %c0_59 = arith.constant 0 : index
    %c0_60 = arith.constant 0 : index
    %c0_61 = arith.constant 0 : index
    %107 = vector.load %arg12[%c0_59, %c0_60, %c0_61] : memref<4x10x64xf32, #tpu.memory_space<vmem>>, vector<1x10x64xf32>
    %108 = vector.shape_cast %107 : vector<1x10x64xf32> to vector<10x64xf32>
    %cst_62 = arith.constant dense<0.000000e+00> : vector<2x10xf32>
    %109 = tpu.matmul %102, %108, %cst_62 {dimension_numbers = #tpu.dot_dimension_numbers<[1], [1], [0], [0], [0, 0, 1, 0], [], []>} : vector<2x64xf32>, vector<10x64xf32>, vector<2x10xf32> -> vector<2x10xf32>
    %110 = arith.addf %101, %109 : vector<2x10xf32>
    %111 = vector.extract_strided_slice %99 {offsets = [2, 0], sizes = [2, 64], strides = [1, 1]} : vector<8x64xf32> to vector<2x64xf32>
    %112 = arith.mulf %111, %111 : vector<2x64xf32>
    %cst_63 = arith.constant dense<0.000000e+00> : vector<2xf32>
    %113 = vector.multi_reduction <add>, %112, %cst_63 [1] : vector<2x64xf32> to vector<2xf32>
    %114 = vector.shape_cast %113 : vector<2xf32> to vector<2x1xf32>
    %115 = arith.addf %106, %114 : vector<2x1xf32>
    %c1 = arith.constant 1 : index
    %c0_64 = arith.constant 0 : index
    %c0_65 = arith.constant 0 : index
    %116 = vector.load %arg12[%c1, %c0_64, %c0_65] : memref<4x10x64xf32, #tpu.memory_space<vmem>>, vector<1x10x64xf32>
    %117 = vector.shape_cast %116 : vector<1x10x64xf32> to vector<10x64xf32>
    %cst_66 = arith.constant dense<0.000000e+00> : vector<2x10xf32>
    %118 = tpu.matmul %111, %117, %cst_66 {dimension_numbers = #tpu.dot_dimension_numbers<[1], [1], [0], [0], [0, 0, 1, 0], [], []>} : vector<2x64xf32>, vector<10x64xf32>, vector<2x10xf32> -> vector<2x10xf32>
    %119 = arith.addf %110, %118 : vector<2x10xf32>
    %120 = vector.extract_strided_slice %99 {offsets = [4, 0], sizes = [2, 64], strides = [1, 1]} : vector<8x64xf32> to vector<2x64xf32>
    %121 = arith.mulf %120, %120 : vector<2x64xf32>
    %cst_67 = arith.constant dense<0.000000e+00> : vector<2xf32>
    %122 = vector.multi_reduction <add>, %121, %cst_67 [1] : vector<2x64xf32> to vector<2xf32>
    %123 = vector.shape_cast %122 : vector<2xf32> to vector<2x1xf32>
    %124 = arith.addf %115, %123 : vector<2x1xf32>
    %c2_68 = arith.constant 2 : index
    %c0_69 = arith.constant 0 : index
    %c0_70 = arith.constant 0 : index
    %125 = vector.load %arg12[%c2_68, %c0_69, %c0_70] : memref<4x10x64xf32, #tpu.memory_space<vmem>>, vector<1x10x64xf32>
    %126 = vector.shape_cast %125 : vector<1x10x64xf32> to vector<10x64xf32>
    %cst_71 = arith.constant dense<0.000000e+00> : vector<2x10xf32>
    %127 = tpu.matmul %120, %126, %cst_71 {dimension_numbers = #tpu.dot_dimension_numbers<[1], [1], [0], [0], [0, 0, 1, 0], [], []>} : vector<2x64xf32>, vector<10x64xf32>, vector<2x10xf32> -> vector<2x10xf32>
    %128 = arith.addf %119, %127 : vector<2x10xf32>
    %129 = vector.extract_strided_slice %99 {offsets = [6, 0], sizes = [2, 64], strides = [1, 1]} : vector<8x64xf32> to vector<2x64xf32>
    %130 = arith.mulf %129, %129 : vector<2x64xf32>
    %cst_72 = arith.constant dense<0.000000e+00> : vector<2xf32>
    %131 = vector.multi_reduction <add>, %130, %cst_72 [1] : vector<2x64xf32> to vector<2xf32>
    %132 = vector.shape_cast %131 : vector<2xf32> to vector<2x1xf32>
    %133 = arith.addf %124, %132 : vector<2x1xf32>
    %c3 = arith.constant 3 : index
    %c0_73 = arith.constant 0 : index
    %c0_74 = arith.constant 0 : index
    %134 = vector.load %arg12[%c3, %c0_73, %c0_74] : memref<4x10x64xf32, #tpu.memory_space<vmem>>, vector<1x10x64xf32>
    %135 = vector.shape_cast %134 : vector<1x10x64xf32> to vector<10x64xf32>
    %cst_75 = arith.constant dense<0.000000e+00> : vector<2x10xf32>
    %136 = tpu.matmul %129, %135, %cst_75 {dimension_numbers = #tpu.dot_dimension_numbers<[1], [1], [0], [0], [0, 0, 1, 0], [], []>} : vector<2x64xf32>, vector<10x64xf32>, vector<2x10xf32> -> vector<2x10xf32>
    %137 = arith.addf %128, %136 : vector<2x10xf32>
    %cst_76 = arith.constant 9.99999996E-13 : f32
    %138 = vector.broadcast %cst_76 : f32 to vector<2x1xf32>
    %139 = arith.addf %133, %138 : vector<2x1xf32>
    %140 = math.rsqrt %139 : vector<2x1xf32>
    %c0_77 = arith.constant 0 : index
    %c0_78 = arith.constant 0 : index
    %141 = memref.load %arg13[%c0_77, %c0_78] : memref<1x1xf32, #tpu.memory_space<smem>>
    %142 = vector.broadcast %141 : f32 to vector<2x1xf32>
    %143 = arith.mulf %142, %140 : vector<2x1xf32>
    %144 = vector.broadcast %143 : vector<2x1xf32> to vector<2x10xf32>
    %145 = arith.mulf %144, %137 : vector<2x10xf32>
    %c0_79 = arith.constant 0 : index
    %c0_80 = arith.constant 0 : index
    %146 = vector.load %arg14[%c0_79, %c0_80] : memref<2x10xf32, #tpu.memory_space<vmem>>, vector<2x10xf32>
    tpu.vector_store %arg14[%c0_79, %c0_80], %145 {strides = array<i32>} : memref<2x10xf32, #tpu.memory_space<vmem>>, vector<2x10xf32>,
    return
  }
}

</mosaic_0001>

<bundles_post_ra>
// kernel: pointclip_forward.1
= control target key start
LH: loop header
LB: loop body
LE: loop exit
PB: predicated region body
PF: predicated region fallthrough
CT: control target
= control target key end

     0   :  { %v1052_v7 = vmov 0.0|0.0   ;;  %v1053_v34 = vmov 127.0   ;;  %s1380_s0 = inlined_call_operand.vmem [shape: f32[8,256], index: 0, kind: input, shape index: {}]   ;;  %s1381_s1 = inlined_call_operand.vmem [shape: f32[8,256], index: 1, kind: input, shape index: {}]   ;;  %s1382_s2 = inlined_call_operand.vmem [shape: f32[256,64], index: 2, kind: input, shape index: {}]   ;;  %s1383_s3 = inlined_call_operand.vmem [shape: f32[1,64], index: 3, kind: input, shape index: {}]   ;;  %s1384_s4 = inlined_call_operand.vmem [shape: f32[1,64], index: 4, kind: input, shape index: {}]   ;;  %s1385_s5 = inlined_call_operand.vmem [shape: f32[1,64], index: 5, kind: input, shape index: {}]   ;;  %s1386_s6 = inlined_call_operand.vmem [shape: f32[64,8], index: 6, kind: input, shape index: {}]   ;;  %s1387_s7 = inlined_call_operand.vmem [shape: f32[1,8], index: 7, kind: input, shape index: {}]   ;;  %s1388_s8 = inlined_call_operand.vmem [shape: f32[1,8], index: 8, kind: input, shape index: {}]   ;;  %s1389_s9 = inlined_call_operand.vmem [shape: f32[1,8], index: 9, kind: input, shape index: {}]   ;;  %s1390_s10 = inlined_call_operand.vmem [shape: f32[8,64], index: 10, kind: input, shape index: {}]   ;;  %s1391_s11 = inlined_call_operand.vmem [shape: f32[1,64], index: 11, kind: input, shape index: {}]   ;;  %s1392_s12 = inlined_call_operand.vmem [shape: f32[4,10,64], index: 12, kind: input, shape index: {}]   ;;  %s1393_s13 = inlined_call_operand.<no memory space> [shape: f32[1,1], index: 13, kind: input, shape index: {}]   ;;  %s1394_s14 = inlined_call_operand.hbm [shape: f32[2,10], index: 14, kind: output, shape index: {}]  }
   0x1   :  { %v77_v0 = vld [vmem:[%s1382_s2 + $0x80] sm:$0xff]  ;;  %v78_v1 = vld [vmem:[%s1382_s2 + $0x88] sm:$0xff]  ;;  %v79_v5 = vld [vmem:[%s1382_s2 + $0x90] sm:$0xff]  ;;  %986 = vmatprep.subr.bf16.mxu1 %v1052_v7 }
   0x2   :  { %v61_v2 = vld [vmem:[%s1382_s2] sm:$0xff]  ;;  %v954_v3 = vpack.c.bf16 %v78_v1, %v77_v0  ;;  %v62_v4 = vld [vmem:[%s1382_s2 + $0x8] sm:$0xff]  ;;  %v80_v6 = vld [vmem:[%s1382_s2 + $0x98] sm:$0xff] }
   0x3   :  { %v956_v8 = vpack.c.bf16 %v62_v4, %v61_v2  ;;  %v958_v9 = vpack.c.bf16 %v80_v6, %v79_v5  ;;  %v63_v10 = vld [vmem:[%s1382_s2 + $0x10] sm:$0xff]  ;;  %v64_v11 = vld [vmem:[%s1382_s2 + $0x18] sm:$0xff]  ;;  %v81_v12 = vld [vmem:[%s1382_s2 + $0xa0] sm:$0xff] }
   0x4   :  { %955 = vmatprep.subr.bf16.mxu0 %v954_v3  ;;  %v82_v13 = vld [vmem:[%s1382_s2 + $0xa8] sm:$0xff]  ;;  %v960_v14 = vpack.c.bf16 %v64_v11, %v63_v10  ;;  %v65_v16 = vld [vmem:[%s1382_s2 + $0x20] sm:$0xff]  ;;  %v83_v18 = vld [vmem:[%s1382_s2 + $0xb0] sm:$0xff] }
   0x5   :  { %957 = vmatpush3.bf16.msra.mxu0 %v956_v8  ;;  %v962_v15 = vpack.c.bf16 %v82_v13, %v81_v12  ;;  %v66_v17 = vld [vmem:[%s1382_s2 + $0x28] sm:$0xff]  ;;  %v84_v19 = vld [vmem:[%s1382_s2 + $0xb8] sm:$0xff]  ;;  %v67_v22 = vld [vmem:[%s1382_s2 + $0x30] sm:$0xff] }
   0x6   :  { %959 = vmatprep.subr.bf16.mxu0 %v958_v9  ;;  %v964_v20 = vpack.c.bf16 %v66_v17, %v65_v16  ;;  %v966_v21 = vpack.c.bf16 %v84_v19, %v83_v18  ;;  %v68_v23 = vld [vmem:[%s1382_s2 + $0x38] sm:$0xff]  ;;  %v85_v24 = vld [vmem:[%s1382_s2 + $0xc0] sm:$0xff]  ;;  %v86_v25 = vld [vmem:[%s1382_s2 + $0xc8] sm:$0xff] }
   0x7   :  { %v69_v26 = vld [vmem:[%s1382_s2 + $0x40] sm:$0xff]  ;;  %v50_v27 = vld [vmem:[%s1380_s0 + $0x8] sm:$0xff]  ;;  %v968_v29 = vpack.c.bf16 %v68_v23, %v67_v22  ;;  %v970_v33 = vpack.c.bf16 %v86_v25, %v85_v24  ;;  %v188_v37 = vld [vmem:[%s1386_s6 + $0x10] sm:$0xff] }
   0x8   :  { %v56_v28 = vld [vmem:[%s1381_s1 + $0x8] sm:$0xff]  ;;  %vm52_vm0 = vcmp.gt.f32.partialorder %v50_v27, 0.0  ;;  %v186_v31 = vld [vmem:[%s1386_s6] sm:$0xff]  ;;  %v189_v38 = vld [vmem:[%s1386_s6 + $0x18] sm:$0xff] }
   0x9   :  { %961 = vmatpush3.bf16.msra.mxu0 %v960_v14  ;;  %v70_v30 = vld [vmem:[%s1382_s2 + $0x48] sm:$0xff]  ;;  %vm58_vm1 = vcmp.gt.f32.partialorder %v56_v28, 0.0  ;;  %v54_v35 = vsel %vm52_vm0, 255.0, %v1053_v34  ;;  %v87_v39 = vld [vmem:[%s1382_s2 + $0xd0] sm:$0xff]  ;;  %v88_v40 = vld [vmem:[%s1382_s2 + $0xd8] sm:$0xff]  ;;  %v990_v41 = vpack.c.bf16 %v189_v38, %v188_v37 }
   0xa   :  { %963 = vmatprep.subr.bf16.mxu0 %v962_v15  ;;  %v187_v32 = vld [vmem:[%s1386_s6 + $0x8] sm:$0xff]  ;;  %vm806_vm2 = vmneg %vm58_vm1 }
   0xb   :  { %v987_v36 = vpack.c.bf16 %v187_v32, %v186_v31  ;;  %807 = vmatprep.mubr.msk.f32.mxu0 %vm806_vm2, %v54_v35 }
   0xd   :  { %965 = vmatpush3.bf16.msra.mxu0 %v964_v20  ;;  %988 = vmatpush3.bf16.msra.mxu1 %v987_v36 }
   0xe   :  { %967 = vmatprep.subr.bf16.mxu0 %v966_v21 }
   0xf   :  { %20 = vsyncpa [#allocation5], 0  ;;  %v972_v42 = vpack.c.bf16 %v70_v30, %v69_v26  ;;  %989 = vmatprep.subr.bf16.mxu1 %v1052_v7  ;;  %v974_v43 = vpack.c.bf16 %v88_v40, %v87_v39  ;;  %v71_v44 = vld [vmem:[%s1382_s2 + $0x50] sm:$0xff]  ;;  %v72_v45 = vld [vmem:[%s1382_s2 + $0x58] sm:$0xff]  ;;  %vm1054_vm6 = vmmov 0   ;;  %v1055_v4 = vmov 0.0  }
  0x10   :  { %v89_v46 = vld [vmem:[%s1382_s2 + $0xe0] sm:$0xff]  ;;  %v90_v47 = vld [vmem:[%s1382_s2 + $0xe8] sm:$0xff]  ;;  %v976_v48 = vpack.c.bf16 %v72_v45, %v71_v44  ;;  %v91_v52 = vld [vmem:[%s1382_s2 + $0xf0] sm:$0xff]  ;;  %918 = vmatprep.mubr.msk.f32.mxu1 %vm1054_vm6, %v1055_v4  ;;  %vm201_vm7 = vcmask 523264   ;;  %vm298_vm8 = vcmask 58368   ;;  %vm341_vm13 = vcmask 64512  }
  0x11   :  { %969 = vmatpush3.bf16.msra.mxu0 %v968_v29  ;;  %991 = vmatpush3.bf16.msra.mxu1 %v990_v41  ;;  %v978_v49 = vpack.c.bf16 %v90_v47, %v89_v46  ;;  %v73_v50 = vld [vmem:[%s1382_s2 + $0x60] sm:$0xff]  ;;  %v74_v51 = vld [vmem:[%s1382_s2 + $0x68] sm:$0xff]  ;;  %v92_v53 = vld [vmem:[%s1382_s2 + $0xf8] sm:$0xff]  ;;  %vm596_vm15 = vcmask 521220   ;;  %vm427_vm0 = vcmask 519170   ;;  %vm687_vm1 = vcmask 523270  }
  0x12   :  { %971 = vmatprep.subr.bf16.mxu0 %v970_v33  ;;  %992 = vmatprep.subr.bf16.mxu1 %v1052_v7  ;;  %v980_v54 = vpack.c.bf16 %v74_v51, %v73_v50  ;;  %v982_v55 = vpack.c.bf16 %v92_v53, %v91_v52  ;;  %v75_v56 = vld [vmem:[%s1382_s2 + $0x70] sm:$0xff]  ;;  %v76_v57 = vld [vmem:[%s1382_s2 + $0x78] sm:$0xff]  ;;  %v49_v58 = vld [vmem:[%s1380_s0] sm:$0xff]  ;;  %vm420_vm2 = vcmask 517120   ;;  %s1057_s22 = smov [#allocation4]  }
  0x13   :  { %v55_v59 = vld [vmem:[%s1381_s1] sm:$0xff]  ;;  %v984_v60 = vpack.c.bf16 %v76_v57, %v75_v56  ;;  %vm51_vm3 = vcmp.gt.f32.partialorder %v49_v58, 0.0  ;;  %v191_v63 = vld [vmem:[%s1386_s6 + $0x28] sm:$0xff]  ;;  %v192_v1 = vld [vmem:[%s1386_s6 + $0x30] sm:$0xff] }
  0x14   :  { %vm57_vm4 = vcmp.gt.f32.partialorder %v55_v59, 0.0  ;;  %v53_v61 = vsel %vm51_vm3, 255.0, %v1053_v34  ;;  %v190_v62 = vld [vmem:[%s1386_s6 + $0x20] sm:$0xff]  ;;  %v193_v2 = vld [vmem:[%s1386_s6 + $0x38] sm:$0xff]  ;;  %vm1321_vm14 = vmpackc.low %vm201_vm7, %vm201_vm7  ;;  %vm789_vm3 = vcmask 74752  }
  0x15   :  { %973 = vmatpush3.bf16.msra.mxu0 %v972_v42  ;;  %vm808_vm5 = vmneg %vm57_vm4  ;;  %v993_v0 = vpack.c.bf16 %v191_v63, %v190_v62  ;;  %v996_v3 = vpack.c.bf16 %v193_v2, %v192_v1  ;;  %v805_v6 = vld [vmem:[%s1383_s3] ss:$0 sm:$0xff]  ;;  %v826_v52 = vld [vmem:[%s1392_s12 + $0x10] sm:$0xff]  ;;  %s797_s3 = sshll.u32 %s1057_s22, 4  ;;  %s798_s3 = int_to_ptr.vmem [resolvable:$true] %s797_s3 }
  0x16   :  { %975 = vmatprep.subr.bf16.mxu0 %v974_v43  ;;  %v810_v10 = vld [vmem:[%s1384_s4] ss:$0 sm:$0xff]  ;;  %v827_v53 = vld [vmem:[%s1392_s12 + $0x18] sm:$0x3]  ;;  %s1028_s23 = scalar_lea.vmem %s798_s3, 32  ;;  %p1033_p1 = scmp.lt.s32.totalorder %s798_s3, %s798_s3 }
  0x17   :  { %994 = vmatpush3.bf16.msra.mxu1 %v993_v0  ;;  %v811_v12 = vld [vmem:[%s1385_s5] ss:$0 sm:$0xff]  ;;  %p1029_p0 = scmp.ne.s32.totalorder %s798_s3, %s1028_s23  ;;  %p1034_p2 = scmp.lt.s32.totalorder %s1028_s23, %s1028_s23 }
  0x18   :  { %995 = vmatprep.subr.bf16.mxu1 %v1052_v7  ;;  %v333_v15 = vld [vmem:[%s1390_s10] sm:$0xff] }
  0x19   :  { %977 = vmatpush3.bf16.msra.mxu0 %v976_v48  ;;  %v812_v16 = vld [vmem:[%s1387_s7] ss:$0 sm:$0xff]  ;;  %p1035_p3 = por %p1034_p2, %p1033_p1 }
  0x1a   :  { %979 = vmatprep.subr.bf16.mxu0 %v978_v49  ;;  %v814_v18 = vld [vmem:[%s1388_s8] ss:$0 sm:$0xff]  ;;  %v426_v49 = vld [vmem:[%s1392_s12 + $0x8] sm:$0x3] }
  0x1b   :  { %997 = vmatpush3.bf16.msra.mxu1 %v996_v3  ;;  %v815_v21 = vld [vmem:[%s1389_s9] ss:$0 sm:$0xff]  ;;  %p1036_p4 = pnand %p1035_p3, %p1029_p0 }
  0x1c   :  { %921 = vmatprep.subr.mxu1 %v1055_v4  ;;  %v425_v48 = vld [vmem:[%s1392_s12] sm:$0xff] }
  0x1d   :  { %981 = vmatpush3.bf16.msra.mxu0 %v980_v54  ;;  %v1003_v50 = vpack.c.bf16 %v426_v49, %v425_v48  ;;  %v999_v54 = vpack.c.bf16 %v827_v53, %v826_v52 }
  0x1e   :  { %983 = vmatprep.subr.bf16.mxu0 %v982_v55  ;;  %v824_v55 = vld [vmem:[%s1391_s11] ss:$0 sm:$0xff] }
  0x21   :  { %985 = vmatpush3.bf16.msra.mxu0 %v984_v60  ;;  %v834_v60 = vld [vmem:[%s1392_s12 + $0x20] sm:$0xff] }
  0x22   :  { %998 = vmatprep.subr.bf16.mxu0 %v1052_v7 }
  0x24   :  { %809 = vmatmul.mubr.msk.f32.vlgmr.msra.gmra.mrb[0].mxu0 %vm808_vm5, %v53_v61  ;;  %v835_v61 = vld [vmem:[%s1392_s12 + $0x28] sm:$0x3] }
  0x25   :  { %930 = vmatprep.mubr.msk.f32.mxu0 %vm1054_vm6, %v1055_v4  ;;  %v1007_v0 = vpack.c.bf16 %v835_v61, %v834_v60 }
  0x2a   :  { %1001 = vmatpush3.bf16.xpose.msk.msra.mxu0 %vm1321_vm14, %v999_v54 }
  0xf7   :  { %v876_v5 = vpop.f32.mrb[0].mxu0 }
  0xf8   :  { %v877_v8 = vpop.f32.mrb[1].mxu0 }
  0xf9   :  { %v878_v9 = vadd.f32 %v877_v8, %v876_v5  ;;  %v839_v8 = vld [vmem:[%s1392_s12 + $0x30] sm:$0xff] }
  0xfb   :  { %v1281_v11 = vadd.f32 %v878_v9, %v805_v6  ;;  %v840_v9 = vld [vmem:[%s1392_s12 + $0x38] sm:$0x3] }
  0xfd   :  { %v177_v13 = vmul.f32 %v810_v10, %v1281_v11  ;;  %v417_v62 = vmul.f32 0.4, %v1281_v11  ;;  %v1011_v10 = vpack.c.bf16 %v840_v9, %v839_v8 }
  0xff   :  { %v185_v14 = vadd.f32 %v811_v12, %v177_v13 }
 0x101   :  { %919 = vmatmul.mubr.msk.f32.vlgmr.msra.gmra.mrb[0].mxu1 %vm201_vm7, %v185_v14  ;;  %v1056_v14 = vmov 0  }
 0x102   :  { %923 = vmatprep.mubr.msk.f32.mxu1 %vm1054_vm6, %v1055_v4  ;;  %922 = vmatpush3.msra.mxu1 %v333_v15 }
 0x103   :  { %1002 = vmatprep.subr.bf16.mxu1 %v1052_v7  ;;  %1025 = vset.pattern.permute.xlu0 %v1056_v14 }
 0x1d4   :  { %v271_v17 = vpop.f32.mrb[0].mxu1 }
 0x1d5   :  { %v272_v19 = vadd.f32 %v812_v16, %v271_v17  ;;  %v920_v20 = vpop.f32.mrb[1].mxu1 }
 0x1d7   :  { %v282_v22 = vmul.f32 %v814_v18, %v272_v19 }
 0x1d9   :  { %v290_v23 = vadd.f32 %v815_v21, %v282_v22 }
 0x1db   :  { %v816_v24 = vadd.f32 -0.5, %v290_v23  ;;  %v302_v29 = vrot.slane %v290_v23, 2  ;;  %v313_v36 = vrot.slane %v290_v23, 4  ;;  %v324_v43 = vrot.slane %v290_v23, 6 }
 0x1dd   :  { %vm293_vm9 = vcmp.ge.f32.partialorder %v816_v24, 0.0 }
 0x1de   :  { %v817_v25 = vsel %vm293_vm9, 1.0, %v1055_v4 }
 0x1df   :  { %v296_v26 = vsub.f32 1.0, %v817_v25  ;;  %299 = vst.msk [vmem:[#allocation2] sm:$0x3] %vm298_vm8, %v817_v25 }
 0x1e1   :  { %v297_v27 = vmul.f32 %v296_v26, %v290_v23 }
 0x1e3   :  { %v300_v28 = vmul.f32 0.25, %v297_v27 }
 0x1e5   :  { %v304_v30 = vadd.f32 %v302_v29, %v300_v28 }
 0x1e7   :  { %v818_v31 = vadd.f32 -0.5, %v304_v30 }
 0x1e9   :  { %vm306_vm10 = vcmp.ge.f32.partialorder %v818_v31, 0.0 }
 0x1ea   :  { %v819_v32 = vsel %vm306_vm10, 1.0, %v1055_v4 }
 0x1eb   :  { %v309_v33 = vsub.f32 1.0, %v819_v32  ;;  %311 = vst.msk [vmem:[#allocation2 + $0x2] sm:$0x3] %vm298_vm8, %v819_v32 }
 0x1ed   :  { %v310_v34 = vmul.f32 %v309_v33, %v304_v30 }
 0x1ef   :  { %v312_v35 = vmul.f32 0.25, %v310_v34 }
 0x1f1   :  { %v315_v37 = vadd.f32 %v313_v36, %v312_v35 }
 0x1f3   :  { %v820_v38 = vadd.f32 -0.5, %v315_v37 }
 0x1f5   :  { %vm317_vm11 = vcmp.ge.f32.partialorder %v820_v38, 0.0 }
 0x1f6   :  { %v821_v39 = vsel %vm317_vm11, 1.0, %v1055_v4 }
 0x1f7   :  { %v320_v40 = vsub.f32 1.0, %v821_v39  ;;  %322 = vst.msk [vmem:[#allocation2 + $0x4] sm:$0x3] %vm298_vm8, %v821_v39 }
 0x1f9   :  { %v321_v41 = vmul.f32 %v320_v40, %v315_v37 }
 0x1fb   :  { %v323_v42 = vmul.f32 0.25, %v321_v41 }
 0x1fd   :  { %v326_v44 = vadd.f32 %v324_v43, %v323_v42 }
 0x1ff   :  { %v822_v45 = vadd.f32 -0.5, %v326_v44 }
 0x201   :  { %vm328_vm12 = vcmp.ge.f32.partialorder %v822_v45, 0.0 }
 0x202   :  { %v823_v46 = vsel %vm328_vm12, 1.0, %v1055_v4 }
 0x203   :  { %331 = vst.msk [vmem:[#allocation2 + $0x6] sm:$0x3] %vm298_vm8, %v823_v46 }
 0x20a   :  { %v332_v47 = vld [vmem:[#allocation2] sm:$0xff] }
 0x20b   :  { %924 = vmatmul.mubr.msk.f32.vlgmr.msra.gmra.mrb[2].mxu1 %vm341_vm13, %v332_v47 }
 0x20c   :  { %937 = vmatprep.mubr.msk.f32.mxu1 %vm1054_vm6, %v1055_v4  ;;  %1005 = vmatpush3.bf16.xpose.msk.msra.mxu1 %vm1321_vm14, %v1003_v50 }
 0x20d   :  { %1006 = vmatprep.subr.bf16.mxu1 %v1052_v7 }
 0x2de   :  { %v411_v56 = vpop.f32.mrb[2].mxu1 }
 0x2df   :  { %v412_v57 = vadd.f32 %v824_v55, %v411_v56  ;;  %v925_v58 = vpop.f32.mrb[3].mxu1 }
 0x2e1   :  { %v415_v59 = vmax.f32 %v412_v57, 0.0 }
 0x2e3   :  { %v416_v63 = vmul.f32 0.6, %v415_v59 }
 0x2e5   :  { %v418_v1 = vadd.f32 %v417_v62, %v416_v63 }
 0x2e7   :  { %938 = vmatmul.mubr.msk.f32.vlgmr.msra.gmra.mrb[4].mxu1 %vm201_vm7, %v418_v1  ;;  %v439_v2 = vrot.slane %v418_v1, 2  ;;  %v419_v3 = vmul.f32 %v418_v1, %v418_v1  ;;  %v607_v13 = vrot.slane %v418_v1, 4 }
 0x2e8   :  { %1009 = vmatpush3.bf16.xpose.msk.msra.mxu1 %vm1321_vm14, %v1007_v0  ;;  %944 = vmatprep.mubr.msk.f32.mxu1 %vm1054_vm6, %v1055_v4 }
 0x2e9   :  { %931 = vmatmul.mubr.msk.f32.vlgmr.msra.gmra.mrb[2].mxu0 %vm201_vm7, %v439_v2  ;;  %v597_v5 = vsel %vm596_vm15, %v419_v3, 0.0  ;;  %v428_v6 = vsel %vm427_vm0, %v419_v3, 0.0  ;;  %1010 = vmatprep.subr.bf16.mxu1 %v1052_v7  ;;  %v688_v11 = vsel %vm687_vm1, %v419_v3, 0.0  ;;  %v421_v12 = vsel %vm420_vm2, %v419_v3, 0.0 }
 0x2ea   :  { %598 = vadd.xlane.f32.xlu1 %v597_v5  ;;  %429 = vadd.xlane.f32.xlu0 %v428_v6  ;;  %v698_v7 = vrot.slane %v418_v1, 6 }
 0x2ee   :  { %689 = vadd.xlane.f32.xlu1 %v688_v11  ;;  %422 = vadd.xlane.f32.xlu0 %v421_v12 }
 0x2ef   :  { %945 = vmatmul.mubr.msk.f32.vlgmr.msra.gmra.mrb[4].mxu1 %vm201_vm7, %v607_v13 }
 0x2f0   :  { %1013 = vmatpush3.bf16.xpose.msk.msra.mxu1 %vm1321_vm14, %v1011_v10  ;;  %951 = vmatprep.mubr.msk.f32.mxu1 %vm1054_vm6, %v1055_v4  ;;  %v781_v4 = vstv %s1393_s13 }
 0x2f7   :  { %952 = vmatmul.mubr.msk.f32.vlgmr.msra.gmra.mrb[4].mxu1 %vm201_vm7, %v698_v7 }
 0x377   :  { %v599_v15 = vpop.xlane.xlu1 %598  ;;  %v430_v16 = vpop.xlane.xlu0 %429 }
 0x378   :  { %v432_v17 = vrot.slane %v430_v16, 2  ;;  %v601_v20 = vrot.slane %v599_v15, 4 }
 0x37b   :  { %v690_v18 = vpop.xlane.xlu1 %689  ;;  %v423_v19 = vpop.xlane.xlu0 %422 }
 0x37c   :  { %v434_v21 = vadd.f32 %v432_v17, %v423_v19  ;;  %v692_v22 = vrot.slane %v690_v18, 6 }
 0x37e   :  { %v603_v23 = vadd.f32 %v601_v20, %v434_v21 }
 0x380   :  { %v694_v24 = vadd.f32 %v692_v22, %v603_v23 }
 0x382   :  { %v778_v25 = vadd.f32 1e-12, %v694_v24 }
 0x384   :  { %1026 = vrsqrt.f32 %v778_v25 }
 0x38e   :  { %v1027_v26 = vpop.eup %1026 }
 0x38f   :  { %v782_v27 = vmul.f32 %v1027_v26, %v781_v4 }
 0x391   :  { %785 = vperm.xlu0 %1025, %v782_v27  }
 0x3bc   :  { %v514_v28 = vpop.f32.mrb[2].mxu0 }
 0x3bd   :  { %v932_v29 = vpop.f32.mrb[3].mxu0 }
 0x3ca   :  { %v773_v30 = vpop.f32.mrb[4].mxu1 }
 0x3cb   :  { %v1014_v31 = vadd.f32 %v773_v30, %v514_v28  ;;  %v953_v32 = vpop.f32.mrb[5].mxu1 }
 0x410   :  { %v786_v33 = vpop.permute.xlu0 %785 }
 0x411   :  { %v788_v34 = vmul.f32 %v1014_v31, %v786_v33 }
 0x413   :  { %790 = vst.msk [vmem:[#allocation4] sm:$0x3] %vm789_vm3, %v788_v34 }
 0x414   :  { %1039 = shalt.err (!%p1036_p4)
}
 0x415   :  { %s1040_s24 = scalar_lea.hbm %s1394_s14, 32 }
 0x416   :  { %p1041_p5 = scmp.ne.s32.totalorder %s1394_s14, %s1040_s24  ;;  %p1044_p6 = scmp.lt.u32.totalorder %s1040_s24, %s1394_s14 }
 0x418   :  { %p1046_p7 = pnand %p1044_p6, %p1041_p5 }
 0x41a   :  { %1049 = shalt.err (!%p1046_p7)
}
 0x41b   :  { %800 = dma.vmem_to_hbm [thread:$0]  %s798_s3, 32, %s1394_s14, [#allocation5]  }
 0x41c   :  { %1050 = dma.done.wait [#allocation5], 32  }
 0x41d   :  { %1051 = vsyncadd [#allocation5], 4294967264 }
 0x41e   :  { %804 = vsyncpa [#allocation5], 1 }

</bundles_post_ra>
